<compile_context>
chip_gen: v5e
topology: v5e:2x2
jax: 0.10.0
libtpu: 0.0.40
codegen_flags: <defaults>
</compile_context>

<pallas_src>
import jax
import jax.numpy as jnp
from jax import lax
from jax.experimental import pallas as pl
from jax.experimental.pallas import tpu as pltpu


# ----------------------------- Pallas kernel --------------------------------
def _pretrained_classifier_kernel(p_ref, wc_ref, pool_ref, wh_ref, bh_ref, o_ref):
    """Fused per-block: conv-as-matmul (+folded bias) -> ReLU -> MXU avg-pool -> head.

    p_ref   : (B, H*W, CK+1)  bf16 im2col patches for B samples (+ ones lane)
    wc_ref  : (CK+1, CFp)     bf16 conv weight, flattened (c, kh, kw), + bias row
    pool_ref: (B, B*H*W)      f32 block-diagonal mean-pool matrix (1/HW entries)
    wh_ref  : (CFp, NCp)      f32 classifier head weight (transposed, padded)
    bh_ref  : (1, NCp)        f32 classifier head bias (padded)
    o_ref   : (1, B, NCp)     f32 logits block (lane-dense, 128-wide)
    """
    bb, hw, ckb = p_ref.shape
    # Encoder conv as one big matmul over B*HW rows; conv bias is folded into
    # the last row of wc via the trailing ones lane of the patches.  f32 acc.
    patches = p_ref[...].reshape(bb * hw, ckb)                       # bf16
    feat = jnp.dot(patches, wc_ref[...],
                   preferred_element_type=jnp.float32)               # (B*HW, CFp)
    feat = jnp.maximum(feat, 0.0)                                    # ReLU
    # Global average pool (== AdaptiveAvgPool2d(1)) as an MXU matmul with a
    # block-diagonal (1/HW) matrix instead of a cross-sublane VPU/XLU sum.
    pooled = jnp.dot(pool_ref[...], feat,
                     preferred_element_type=jnp.float32)             # (B, CFp) f32
    # Classifier head (Linear) in f32, M = B.
    logits = jnp.dot(pooled, wh_ref[...],
                     preferred_element_type=jnp.float32)             # (B, NCp)
    o_ref[...] = (logits + bh_ref[...])[None]


# ------------------------------ JAX wrapper ----------------------------------
def _im2col_nchw(x, k=3, pad=1):
    """x: (N, C, H, W) -> patches (N, H*W, C*k*k), last dim ordered (c, kh, kw)."""
    n, c, h, w = x.shape
    xp = jnp.pad(x, ((0, 0), (0, 0), (pad, pad), (pad, pad)))
    shifts = []
    for kh in range(k):
        for kw in range(k):
            shifts.append(xp[:, :, kh:kh + h, kw:kw + w])            # (N, C, H, W)
    stk = jnp.stack(shifts, axis=2)                                  # (N, C, k*k, H, W)
    stk = jnp.transpose(stk, (0, 3, 4, 1, 2))                        # (N, H, W, C, k*k)
    return stk.reshape(n, h * w, c * k * k)


def _round_up(v, m):
    return ((v + m - 1) // m) * m


def pretrained_classifier_forward(x, conv_w, conv_b, head_w, head_b, *, block_b=32):
    """x: (N, C_in, H, W) float32, NCHW.
    conv_w: (C_feat, C_in, 3, 3) (PyTorch Conv2d layout)
    conv_b: (C_feat,)
    head_w: (n_classes, C_feat)  (PyTorch Linear layout)
    head_b: (n_classes,)
    Returns logits (N, n_classes) float32.
    """
    n, c_in, h, w = x.shape
    c_feat = conv_w.shape[0]
    n_classes = head_w.shape[0]
    k = conv_w.shape[-1]
    hw = h * w
    ck = c_in * k * k
    ck_b = ck + 1                      # + ones lane for the folded conv bias

    cf_p = _round_up(c_feat, 128)      # lane-dense intermediate
    nc_p = _round_up(n_classes, 128)   # lane-dense output store

    # Samples per grid step. Keep the grid length >= 2 whenever N >= 2 so the
    # "parallel" grid axis can shard across v7x's two TensorCores.
    bb = 1 if n < 2 else max(1, min(block_b, n // 2))
    n_pad = _round_up(n, bb)           # (up to bb-1 dead rows in the last step)
    g = n_pad // bb

    # Host-side layout prep. Patches stay UNPADDED in the CK dim in HBM
    # (block dim == full array dim is allowed); Mosaic pads lanes in VMEM only.
    patches = _im2col_nchw(x, k=k, pad=k // 2)                       # (N, HW, CK) f32
    ones = jnp.ones((n, hw, 1), dtype=patches.dtype)
    patches = jnp.concatenate([patches, ones], axis=-1)              # (N, HW, CK+1)
    patches = jnp.pad(patches, ((0, n_pad - n), (0, 0), (0, 0)))
    patches = patches.astype(jnp.bfloat16)                           # (Np, HW, CK+1)

    wc = jnp.transpose(conv_w.reshape(c_feat, ck))                   # (CK, C_feat)
    wc = jnp.concatenate([wc, conv_b[None, :]], axis=0)              # bias row -> (CK+1, C_feat)
    wc = jnp.pad(wc, ((0, 0), (0, cf_p - c_feat))).astype(jnp.bfloat16)

    # Block-diagonal mean-pool matrix: pooled = pool_mat @ feat (on the MXU).
    pool_mat = jnp.kron(jnp.eye(bb, dtype=jnp.float32),
                        jnp.full((1, hw), 1.0 / hw, dtype=jnp.float32))  # (bb, bb*HW)

    # Head kept in f32 (tiny M=bb matmul) for parity with the f32 reference.
    wh = jnp.transpose(head_w).astype(jnp.float32)                   # (C_feat, n_classes)
    wh = jnp.pad(wh, ((0, cf_p - c_feat), (0, nc_p - n_classes)))
    bh = jnp.pad(head_b, (0, nc_p - n_classes)).reshape(1, nc_p).astype(jnp.float32)

    # Explicit scoped-VMEM budget (v5e default is only 16 MiB); capped at v7x's
    # 64 MiB physical VMEM -- for a real encoder size bb so this stays under it.
    ck_vmem = _round_up(ck_b, 128)
    vmem_est = (2 * bb * hw * ck_vmem * 2            # double-buffered patches (bf16)
                + 3 * bb * hw * cf_p * 4             # f32 feat + matmul temps
                + 2 * max(bb, 8) * bb * hw * 4       # pool matrix
                + 2 * max(bb, 8) * nc_p * 4          # output blocks
                + 2 * (ck_vmem * cf_p * 2 + cf_p * nc_p * 4 + nc_p * 4))
    vmem_limit = int(min(max(vmem_est * 3 // 2, 32 * 1024 * 1024),
                         64 * 1024 * 1024))

    out = pl.pallas_call(
        _pretrained_classifier_kernel,
        out_shape=jax.ShapeDtypeStruct((g, bb, nc_p), jnp.float32),
        grid_spec=pltpu.PrefetchScalarGridSpec(
            num_scalar_prefetch=0,
            grid=(g,),
            in_specs=[
                pl.BlockSpec((bb, hw, ck_b), lambda i: (i, 0, 0)),
                # Grid-invariant operands: constant index maps -> fetched once
                # (no per-step re-DMA; explicit Buffered(1) skipped as marginal).
                pl.BlockSpec((ck_b, cf_p), lambda i: (0, 0)),
                pl.BlockSpec((bb, bb * hw), lambda i: (0, 0)),
                pl.BlockSpec((cf_p, nc_p), lambda i: (0, 0)),
                pl.BlockSpec((1, nc_p), lambda i: (0, 0)),
            ],
            out_specs=pl.BlockSpec((1, bb, nc_p), lambda i: (i, 0, 0)),
        ),
        compiler_params=pltpu.CompilerParams(
            dimension_semantics=("parallel",),
            vmem_limit_bytes=vmem_limit),
    )(patches, wc, pool_mat, wh, bh)

    # Strip batch and class padding (cheap XLA reshape + slice).
    return out.reshape(n_pad, nc_p)[:n, :n_classes]


# --------------------------------- main --------------------------------------
if __name__ == "__main__":
    key = jax.random.PRNGKey(0)
    k_x, k_cw, k_cb, k_hw, k_hb = jax.random.split(key, 5)

    # Small shapes consistent with the module's forward.
    N, C_IN, H, W = 2, 4, 16, 16
    C_FEAT = 32            # synthetic encoder output dim (= get_encoder_output_dim)
    NUM_CLASSES = 10

    x = jax.random.normal(k_x, (N, C_IN, H, W), dtype=jnp.float32)

    # Deterministic synthetic parameters (PyTorch layouts).
    conv_w = 0.1 * jax.random.normal(k_cw, (C_FEAT, C_IN, 3, 3), dtype=jnp.float32)
    conv_b = 0.01 * jax.random.normal(k_cb, (C_FEAT,), dtype=jnp.float32)
    head_w = 0.1 * jax.random.normal(k_hw, (NUM_CLASSES, C_FEAT), dtype=jnp.float32)
    head_b = 0.01 * jax.random.normal(k_hb, (NUM_CLASSES,), dtype=jnp.float32)

    logits = pretrained_classifier_forward(x, conv_w, conv_b, head_w, head_b)
    jax.block_until_ready(logits)
    assert logits.shape == (N, NUM_CLASSES)

    # Loose f32 reference check (conv matmul runs in bf16; pool/head in f32).
    feat_ref = lax.conv_general_dilated(
        x, conv_w, window_strides=(1, 1), padding="SAME",
        dimension_numbers=("NCHW", "OIHW", "NCHW"))
    feat_ref = jnp.maximum(feat_ref + conv_b[None, :, None, None], 0.0)
    pooled_ref = feat_ref.mean(axis=(2, 3))
    logits_ref = pooled_ref @ head_w.T + head_b
    assert jnp.allclose(logits, logits_ref, rtol=1e-1, atol=5e-2), (
        float(jnp.max(jnp.abs(logits - logits_ref))))

    print("KERNEL_OK")
</pallas_src>

<mosaic_0001>
module attributes {stable_mosaic.version = 11 : i64} {
  func.func @_pretrained_classifier_kernel(%arg0: i32, %arg1: memref<1x256x37xbf16, #tpu.memory_space<vmem>>, %arg2: memref<37x128xbf16, #tpu.memory_space<vmem>>, %arg3: memref<1x256xf32, #tpu.memory_space<vmem>>, %arg4: memref<128x128xf32, #tpu.memory_space<vmem>>, %arg5: memref<1x128xf32, #tpu.memory_space<vmem>>, %arg6: memref<1x1x128xf32, #tpu.memory_space<vmem>>) attributes {dimension_semantics = [#tpu.dimension_semantics<parallel>], iteration_bounds = array<i64: 2>, scalar_prefetch = 0 : i64, scratch_operands = 0 : i64, tpu.core_type = #tpu.core_type<tc>, window_params = [{transform_indices = @transform_0, window_bounds = array<i64: 1, 256, 37>}, {pipeline_mode = #tpu.pipeline_mode<synchronous>, transform_indices = @transform_1, window_bounds = array<i64: 37, 128>}, {pipeline_mode = #tpu.pipeline_mode<synchronous>, transform_indices = @transform_2, window_bounds = array<i64: 1, 256>}, {pipeline_mode = #tpu.pipeline_mode<synchronous>, transform_indices = @transform_3, window_bounds = array<i64: 128, 128>}, {pipeline_mode = #tpu.pipeline_mode<synchronous>, transform_indices = @transform_4, window_bounds = array<i64: 1, 128>}, {transform_indices = @transform_5, window_bounds = array<i64: 1, 1, 128>}]} {
    %c0 = arith.constant 0 : index
    %c0_0 = arith.constant 0 : index
    %c0_1 = arith.constant 0 : index
    %0 = vector.load %arg1[%c0, %c0_0, %c0_1] : memref<1x256x37xbf16, #tpu.memory_space<vmem>>, vector<1x256x37xbf16>
    %1 = vector.shape_cast %0 : vector<1x256x37xbf16> to vector<256x37xbf16>
    %c0_2 = arith.constant 0 : index
    %c0_3 = arith.constant 0 : index
    %2 = vector.load %arg2[%c0_2, %c0_3] : memref<37x128xbf16, #tpu.memory_space<vmem>>, vector<37x128xbf16>
    %cst = arith.constant dense<0.000000e+00> : vector<256x128xf32>
    %3 = tpu.matmul %1, %2, %cst {dimension_numbers = #tpu.dot_dimension_numbers<[1], [0], [0], [1], [0, 0, 1, 1], [], []>} : vector<256x37xbf16>, vector<37x128xbf16>, vector<256x128xf32> -> vector<256x128xf32>
    %cst_4 = arith.constant 0.000000e+00 : f32
    %4 = vector.broadcast %cst_4 : f32 to vector<256x128xf32>
    %5 = arith.maximumf %3, %4 : vector<256x128xf32>
    %c0_5 = arith.constant 0 : index
    %c0_6 = arith.constant 0 : index
    %6 = vector.load %arg3[%c0_5, %c0_6] : memref<1x256xf32, #tpu.memory_space<vmem>>, vector<1x256xf32>
    %cst_7 = arith.constant dense<0.000000e+00> : vector<1x128xf32>
    %7 = tpu.matmul %6, %5, %cst_7 {dimension_numbers = #tpu.dot_dimension_numbers<[1], [0], [0], [1], [0, 0, 1, 1], [], []>} : vector<1x256xf32>, vector<256x128xf32>, vector<1x128xf32> -> vector<1x128xf32>
    %c0_8 = arith.constant 0 : index
    %c0_9 = arith.constant 0 : index
    %8 = vector.load %arg4[%c0_8, %c0_9] : memref<128x128xf32, #tpu.memory_space<vmem>>, vector<128x128xf32>
    %cst_10 = arith.constant dense<0.000000e+00> : vector<1x128xf32>
    %9 = tpu.matmul %7, %8, %cst_10 {dimension_numbers = #tpu.dot_dimension_numbers<[1], [0], [0], [1], [0, 0, 1, 1], [], []>} : vector<1x128xf32>, vector<128x128xf32>, vector<1x128xf32> -> vector<1x128xf32>
    %c0_11 = arith.constant 0 : index
    %c0_12 = arith.constant 0 : index
    %10 = vector.load %arg5[%c0_11, %c0_12] : memref<1x128xf32, #tpu.memory_space<vmem>>, vector<1x128xf32>
    %11 = arith.addf %9, %10 : vector<1x128xf32>
    %12 = vector.shape_cast %11 : vector<1x128xf32> to vector<1x1x128xf32>
    %c0_13 = arith.constant 0 : index
    %c0_14 = arith.constant 0 : index
    %c0_15 = arith.constant 0 : index
    %13 = vector.load %arg6[%c0_13, %c0_14, %c0_15] : memref<1x1x128xf32, #tpu.memory_space<vmem>>, vector<1x1x128xf32>
    tpu.vector_store %arg6[%c0_13, %c0_14, %c0_15], %12 {strides = array<i32>} : memref<1x1x128xf32, #tpu.memory_space<vmem>>, vector<1x1x128xf32>,
    return
  }
  func.func @transform_0(%arg0: i32) -> (i32, i32, i32) {
    %c0_i32 = arith.constant 0 : i32
    %c0_i32_0 = arith.constant 0 : i32
    %c0_i32_1 = arith.constant 0 : i32
    return %arg0, %c0_i32, %c0_i32_0 : i32, i32, i32
  }
  func.func @transform_1(%arg0: i32) -> (i32, i32) {
    %c0_i32 = arith.constant 0 : i32
    %c0_i32_0 = arith.constant 0 : i32
    %c0_i32_1 = arith.constant 0 : i32
    return %c0_i32, %c0_i32_0 : i32, i32
  }
  func.func @transform_2(%arg0: i32) -> (i32, i32) {
    %c0_i32 = arith.constant 0 : i32
    %c0_i32_0 = arith.constant 0 : i32
    %c0_i32_1 = arith.constant 0 : i32
    return %c0_i32, %c0_i32_0 : i32, i32
  }
  func.func @transform_3(%arg0: i32) -> (i32, i32) {
    %c0_i32 = arith.constant 0 : i32
    %c0_i32_0 = arith.constant 0 : i32
    %c0_i32_1 = arith.constant 0 : i32
    return %c0_i32, %c0_i32_0 : i32, i32
  }
  func.func @transform_4(%arg0: i32) -> (i32, i32) {
    %c0_i32 = arith.constant 0 : i32
    %c0_i32_0 = arith.constant 0 : i32
    %c0_i32_1 = arith.constant 0 : i32
    return %c0_i32, %c0_i32_0 : i32, i32
  }
  func.func @transform_5(%arg0: i32) -> (i32, i32, i32) {
    %c0_i32 = arith.constant 0 : i32
    %c0_i32_0 = arith.constant 0 : i32
    %c0_i32_1 = arith.constant 0 : i32
    return %arg0, %c0_i32, %c0_i32_0 : i32, i32, i32
  }
}

</mosaic_0001>

<bundles_post_ra>
// kernel: tpu_custom_call.1
= control target key start
LH: loop header
LB: loop body
LE: loop exit
PB: predicated region body
PF: predicated region fallthrough
CT: control target
= control target key end

     0   :  { %10 = vsyncpa [#allocation3], 0  ;;  %s1147_s0 = inlined_call_operand.vmem [shape: bf16[2,256,37], index: 0, kind: input, shape index: {}]   ;;  %s1148_s1 = inlined_call_operand.vmem [shape: bf16[37,128], index: 1, kind: input, shape index: {}]   ;;  %s1149_s2 = inlined_call_operand.vmem [shape: f32[1,256], index: 2, kind: input, shape index: {}]   ;;  %s1150_s3 = inlined_call_operand.vmem [shape: f32[128,128], index: 3, kind: input, shape index: {}]   ;;  %s1151_s4 = inlined_call_operand.vmem [shape: f32[1,128], index: 4, kind: input, shape index: {}]   ;;  %s1152_s5 = inlined_call_operand.hbm [shape: f32[2,1,128], index: 5, kind: output, shape index: {}]  }
   0x1   :  { %12 = vsyncpa [#allocation3 + $0x1], 0  ;;  %s943_s18 = smov 0   ;;  %s945_s19 = smov 0  }
   0x2   :  { %s947_s20 = smov 0   ;;  %s949_s21 = smov 0  }
   0x3 LB: > { %s964_s22 = sadd.s32 4294967295, %s910_s21   ;;  %s684_s23 = sadd.s32 4294967294, %s910_s21   ;;  %s910_s21 = sphi %s949_s21, %s1158_s21   ;;  %s906_s20 = sphi %s947_s20, %s1157_s20   ;;  %s902_s19 = sphi %s945_s19, %s1156_s19   ;;  %s898_s18 = sphi %s943_s18, %s1155_s18  }
   0x4   : > { %s968_s24 = sadd.s32 1, %s910_s21   ;;  %s135_s25 = sadd.s32 1, %s906_s20 }
   0x5   : > { %s132_s26 = ssub.s32 %s910_s21, %s968_s24  ;;  %p145_p0 = scmp.ne.s32.totalorder %s906_s20, %s902_s19 }
   0x6   : > { %p133_p1 = scmp.eq.s32.totalorder %s132_s26, 0  ;;  %p146_p2 = scmp.eq.s32.totalorder %s964_s22, 1 }
   0x7   : > { %p151_p3 = scmp.ne.s32.totalorder %s902_s19, %s898_s18  ;;  %p152_p4 = scmp.eq.s32.totalorder %s684_s23, 1 }
   0x8   : > { %s979_s27 = scalar_select %p133_p1, %s906_s20, %s135_s25  }
   0x9   : > { %p981_p5 = por %p146_p2, %p145_p0  ;;  %p985_p6 = por %p152_p4, %p151_p3 }
   0xa   : > { %p687_p7 = scmp.ge.s32.totalorder %s910_s21, 1  ;;  %p190_p8 = scmp.lt.s32.totalorder %s910_s21, 3 }
   0xc   : > { %p191_p9 = pnand %p687_p7, %p190_p8 }
   0xd   : > { %p217_p10 = scmp.lt.s32.totalorder (!%p191_p9), %s964_s22, 1  ;;  %s215_s23 = sand.u32 (!%p191_p9), 1, %s902_s19  }
   0xe   : > { %194 = sbr.rel (%p191_p9) target bundleno = 559 (0x22f), region = 40  ;;  %s625_s30 = scalar_lea.hbm (!%p191_p9), %s1152_s5, %s964_s22 }
   0xf   : > { %s216_s8 = scalar_lea.vmem (!%p191_p9), [#allocation2], %s215_s23  ;;  %s617_s11 = scalar_lea.sflag (!%p191_p9), [#allocation3], %s215_s23 }
  0x10   : > { %s627_s9 = sshll.u32 (!%p191_p9), %s216_s8, 4  ;;  %s628_s9 = int_to_ptr.vmem [resolvable:$true] %s627_s9 }
  0x13   : > { %v259_v0 = vld [vmem:[%s1148_s1 + $0x10] sm:$0x7]  ;;  %vm404_vm0 = vcmask 1041408   ;;  %vm405_vm1 = vcmask 1042432   ;;  %v912_v2 = vmov 65535   ;;  %s218_s7 = scalar_select %p217_p10, %s964_s22, 1 }
  0x14   : > { %v349_v1 = vunpack.c.l.b16 %v259_v0  ;;  %v406_v3 = vsel %vm404_vm0, 4294967295, %v912_v2  ;;  %v798_v7 = vld [vmem:[%s1148_s1 + $0x8] sm:$0xff]  ;;  %v797_v8 = vld [vmem:[%s1148_s1] sm:$0xff]  ;;  %vm355_vm2 = vcmask 302080  }
  0x15   : > { %v407_v4 = vsel %vm405_vm1, %v406_v3, 0  ;;  %s780_s10 = sshll.u32 %s218_s7, 7 }
  0x16   : > { %v352_v5 = vpack.c.b16 %v349_v1, %v349_v1  ;;  %s1005_s15 = scalar_lea.vmem %s1147_s0, %s780_s10  ;;  %v1052_v1 = vld [vmem:[%s1149_s2] sm:$0x3]  ;;  %s629_s10 = sshll.u32 %s625_s30, 4  ;;  %s630_s10 = int_to_ptr.hbm [resolvable:$true] %s629_s10 }
  0x17   : > { %v781_v9 = vld [vmem:[%s1005_s15] sm:$0xff]  ;;  %v786_v10 = vld [vmem:[%s1005_s15 + $0x28] sm:$0xff]  ;;  %v787_v13 = vld [vmem:[%s1005_s15 + $0x30] sm:$0xff]  ;;  %s862_s12 = sshra.s32 %s630_s10, 4  ;;  %s863_s12 = int_to_ptr.hbm [resolvable:$true] %s862_s12 }
  0x18   : > { %v409_v6 = vand.u32 %v407_v4, %v352_v5  ;;  %v793_v11 = vld [vmem:[%s1005_s15 + $0x60] sm:$0xff]  ;;  %v782_v12 = vld [vmem:[%s1005_s15 + $0x8] sm:$0xff]  ;;  %v783_v15 = vld [vmem:[%s1005_s15 + $0x10] sm:$0xff]  ;;  %v534_v5 = vperm.slane %v1052_v1, 0  ;;  %s864_s13 = scalar_lea.hbm %s863_s12, 1  ;;  %p869_p0 = scmp.lt.s32.totalorder %s863_s12, %s1152_s5 }
  0x19   : > { %v794_v14 = vld [vmem:[%s1005_s15 + $0x68] sm:$0xff]  ;;  %v788_v16 = vld [vmem:[%s1005_s15 + $0x38] sm:$0xff]  ;;  %v795_v17 = vld [vmem:[%s1005_s15 + $0x70] sm:$0xff]  ;;  %p865_p11 = scmp.ne.s32.totalorder %s863_s12, %s864_s13 }
  0x1a   : > { %416 = vmatpush.bf16.msra.mxu0 %v409_v6  ;;  %799 = vmatpush.bf16.msra.mxu1 %v409_v6  ;;  %v791_v18 = vld [vmem:[%s1005_s15 + $0x50] sm:$0xff]  ;;  %v784_v19 = vld [vmem:[%s1005_s15 + $0x18] sm:$0xff]  ;;  %v789_v20 = vld [vmem:[%s1005_s15 + $0x40] sm:$0xff] }
  0x1b   : > { %801 = vmatpush.bf16.msra.mxu3 %v409_v6  ;;  %800 = vmatpush.bf16.msra.mxu2 %v409_v6  ;;  %v796_v21 = vld [vmem:[%s1005_s15 + $0x78] sm:$0xff]  ;;  %v785_v23 = vld [vmem:[%s1005_s15 + $0x20] sm:$0xff]  ;;  %v790_v24 = vld [vmem:[%s1005_s15 + $0x48] sm:$0xff]  ;;  %p866_p12 = pnand %p865_p11, %p981_p5 }
  0x1c   : > { %v792_v22 = vld [vmem:[%s1005_s15 + $0x58] sm:$0xff]  ;;  %s868_s15 = scalar_lea.hbm %s1152_s5, 2 }
  0x1d   : > { %p867_p13 = pneg %p866_p12  ;;  %p870_p1 = scmp.lt.s32.totalorder %s868_s15, %s864_s13 }
  0x1e   : > { %417 = vmatpush.bf16.msra.mxu0 %v798_v7  ;;  %802 = vmatpush.bf16.msra.mxu1 %v798_v7 }
  0x1f   : > { %804 = vmatpush.bf16.msra.mxu3 %v798_v7  ;;  %803 = vmatpush.bf16.msra.mxu2 %v798_v7  ;;  %p871_p2 = por %p870_p1, %p869_p0 }
  0x21   : > { %p872_p3 = pnand %p871_p2, %p867_p13 }
  0x22   : > { %418 = vmatpush.bf16.msra.mxu0 %v797_v8  ;;  %805 = vmatpush.bf16.msra.mxu1 %v797_v8 }
  0x23   : > { %807 = vmatpush.bf16.msra.mxu3 %v797_v8  ;;  %806 = vmatpush.bf16.msra.mxu2 %v797_v8  ;;  %v593_v8 = vld [vmem:[%s1150_s3 + $0x78] sm:$0xff] }
  0x25   : > { %762 = vmatmul.msk.bf16.vlgmr.msra.gmra.mxu0 %vm355_vm2, %v781_v9  ;;  %767 = vmatmul.msk.bf16.vlgmr.msra.gmra.mxu1 %vm355_vm2, %v786_v10  ;;  %v592_v9 = vld [vmem:[%s1150_s3 + $0x70] sm:$0xff] }
  0x26   : > { %774 = vmatmul.msk.bf16.vlgmr.msra.gmra.mxu3 %vm355_vm2, %v793_v11  ;;  %772 = vmatmul.msk.bf16.vlgmr.msra.gmra.mxu2 %vm355_vm2, %v791_v18  ;;  %v588_v18 = vld [vmem:[%s1150_s3 + $0x50] sm:$0xff] }
  0x27   : > { %595 = vmatpush.msrb.mxu3 %v593_v8 }
  0x29   : > { %596 = vmatpush.msrb.mxu3 %v592_v9 }
  0x35   : > { %763 = vmatmul.msk.bf16.gmra.mxu0 %vm355_vm2, %v782_v12  ;;  %768 = vmatmul.msk.bf16.gmra.mxu1 %vm355_vm2, %v787_v13  ;;  %v591_v12 = vld [vmem:[%s1150_s3 + $0x68] sm:$0xff] }
  0x36   : > { %775 = vmatmul.msk.bf16.gmra.mxu3 %vm355_vm2, %v794_v14  ;;  %773 = vmatmul.msk.bf16.gmra.mxu2 %vm355_vm2, %v792_v22  ;;  %v590_v14 = vld [vmem:[%s1150_s3 + $0x60] sm:$0xff] }
  0x37   : > { %597 = vmatpush.msrb.mxu3 %v591_v12 }
  0x39   : > { %598 = vmatpush.msrb.mxu3 %v590_v14 }
  0x45   : > { %764 = vmatmul.msk.bf16.gmra.mxu0 %vm355_vm2, %v783_v15  ;;  %769 = vmatmul.msk.bf16.gmra.mxu1 %vm355_vm2, %v788_v16  ;;  %v589_v16 = vld [vmem:[%s1150_s3 + $0x58] sm:$0xff] }
  0x46   : > { %776 = vmatmul.msk.bf16.gmra.mxu3 %vm355_vm2, %v795_v17 }
  0x47   : > { %599 = vmatpush.msrb.mxu3 %v589_v16 }
  0x49   : > { %600 = vmatpush.msrb.mxu3 %v588_v18 }
  0x55   : > { %765 = vmatmul.msk.bf16.gmra.mxu0 %vm355_vm2, %v784_v19  ;;  %770 = vmatmul.msk.bf16.gmra.mxu1 %vm355_vm2, %v789_v20 }
  0x56   : > { %777 = vmatmul.msk.bf16.gmra.mxu3 %vm355_vm2, %v796_v21  ;;  %v587_v21 = vld [vmem:[%s1150_s3 + $0x48] sm:$0xff] }
  0x57   : > { %601 = vmatpush.msrb.mxu3 %v587_v21 }
  0x65   : > { %766 = vmatmul.msk.bf16.gmra.mxu0 %vm355_vm2, %v785_v23  ;;  %771 = vmatmul.msk.bf16.gmra.mxu1 %vm355_vm2, %v790_v24  ;;  %v586_v24 = vld [vmem:[%s1150_s3 + $0x40] sm:$0xff] }
  0x66   : > { %602 = vmatpush.msrb.mxu3 %v586_v24 }
  0xa2   : > { %v420_v25 = vpop.f32.mrf.mxu0  ;;  %v445_v26 = vpop.f32.mrf.mxu1 }
  0xa3   : > { %v510_v47 = vmax.f32 %v445_v26, 0.0  ;;  %v500_v4 = vmax.f32 %v420_v25, 0.0  ;;  %v585_v26 = vld [vmem:[%s1150_s3 + $0x38] sm:$0xff] }
  0xa4   : > { %603 = vmatpush.msrb.mxu3 %v585_v26 }
  0xa9   : > { %v1039_v31 = vpop.f32.mrf.mxu3  ;;  %v1045_v55 = vpop.f32.mrf.mxu2 }
  0xaa   : > { %v422_v27 = vpop.f32.mrf.mxu0  ;;  %v447_v28 = vpop.f32.mrf.mxu1  ;;  %v524_v25 = vmax.f32 %v1039_v31, 0.0 }
  0xab   : > { %v511_v45 = vmax.f32 %v447_v28, 0.0  ;;  %v501_v2 = vmax.f32 %v422_v27, 0.0  ;;  %v584_v28 = vld [vmem:[%s1150_s3 + $0x30] sm:$0xff] }
  0xac   : > { %604 = vmatpush.msrb.mxu3 %v584_v28 }
  0xb1   : > { %v1041_v34 = vpop.f32.mrf.mxu3  ;;  %v472_v63 = vpop.f32.mrf.mxu2 }
  0xb2   : > { %v425_v29 = vpop.f32.mrf.mxu0  ;;  %v450_v30 = vpop.f32.mrf.mxu1  ;;  %v525_v22 = vmax.f32 %v1041_v34, 0.0  ;;  %v521_v31 = vmax.f32 %v472_v63, 0.0  ;;  %v520_v34 = vmax.f32 %v1045_v55, 0.0 }
  0xb3   : > { %v512_v43 = vmax.f32 %v450_v30, 0.0  ;;  %v502_v0 = vmax.f32 %v425_v29, 0.0  ;;  %v583_v30 = vld [vmem:[%s1150_s3 + $0x28] sm:$0xff] }
  0xb4   : > { %605 = vmatpush.msrb.mxu3 %v583_v30 }
  0xb9   : > { %v1043_v37 = vpop.f32.mrf.mxu3  ;;  %v475_v11 = vpop.f32.mrf.mxu2 }
  0xba   : > { %v427_v32 = vpop.f32.mrf.mxu0  ;;  %v452_v33 = vpop.f32.mrf.mxu1  ;;  %v526_v19 = vmax.f32 %v1043_v37, 0.0  ;;  %v522_v29 = vmax.f32 %v475_v11, 0.0  ;;  %v580_v37 = vld [vmem:[%s1150_s3 + $0x10] sm:$0xff] }
  0xbb   : > { %v513_v42 = vmax.f32 %v452_v33, 0.0  ;;  %v503_v62 = vmax.f32 %v427_v32, 0.0  ;;  %v582_v33 = vld [vmem:[%s1150_s3 + $0x20] sm:$0xff] }
  0xbc   : > { %606 = vmatpush.msrb.mxu3 %v582_v33 }
  0xc1   : > { %v487_v46 = vpop.f32.mrf.mxu3  ;;  %v477_v23 = vpop.f32.mrf.mxu2 }
  0xc2   : > { %v430_v35 = vpop.f32.mrf.mxu0  ;;  %v455_v36 = vpop.f32.mrf.mxu1  ;;  %v527_v17 = vmax.f32 %v487_v46, 0.0  ;;  %v523_v27 = vmax.f32 %v477_v23, 0.0 }
  0xc3   : > { %v514_v40 = vmax.f32 %v455_v36, 0.0  ;;  %v504_v60 = vmax.f32 %v430_v35, 0.0  ;;  %v581_v35 = vld [vmem:[%s1150_s3 + $0x18] sm:$0xff] }
  0xc4   : > { %607 = vmatpush.msrb.mxu3 %v581_v35 }
  0xc6   : > { %608 = vmatpush.msrb.mxu3 %v580_v37 }
  0xc9   : > { %v490_v49 = vpop.f32.mrf.mxu3 }
  0xca   : > { %v432_v38 = vpop.f32.mrf.mxu0  ;;  %v457_v39 = vpop.f32.mrf.mxu1  ;;  %v528_v15 = vmax.f32 %v490_v49, 0.0 }
  0xcb   : > { %v515_v41 = vmax.f32 %v457_v39, 0.0  ;;  %v505_v59 = vmax.f32 %v432_v38, 0.0 }
  0xcd   : > { %538 = vmatpush.msrb.mxu2 %v515_v41 }
  0xcf   : > { %539 = vmatpush.msrb.mxu2 %v514_v40  ;;  %v535_v40 = vperm.slane %v1052_v1, 1 }
  0xd1   : > { %540 = vmatpush.msrb.mxu2 %v513_v42  ;;  %v492_v51 = vpop.f32.mrf.mxu3  ;;  %v579_v42 = vld [vmem:[%s1150_s3 + $0x8] sm:$0xff] }
  0xd2   : > { %v435_v44 = vpop.f32.mrf.mxu0  ;;  %v1047_v61 = vpop.f32.mrf.mxu1  ;;  %v529_v13 = vmax.f32 %v492_v51, 0.0  ;;  %609 = vmatpush.msrb.mxu3 %v579_v42 }
  0xd3   : > { %541 = vmatpush.msrb.mxu2 %v512_v43  ;;  %v506_v57 = vmax.f32 %v435_v44, 0.0  ;;  %v516_v41 = vmax.f32 %v1047_v61, 0.0  ;;  %v578_v43 = vld [vmem:[%s1150_s3] sm:$0xff] }
  0xd4   : > { %610 = vmatpush.msrb.mxu3 %v578_v43 }
  0xd5   : > { %542 = vmatpush.msrb.mxu2 %v511_v45 }
  0xd7   : > { %543 = vmatpush.msrb.mxu2 %v510_v47  ;;  %v594_v47 = vld [vmem:[%s1151_s4] sm:$0x1] }
  0xd9   : > { %v495_v58 = vpop.f32.mrf.mxu3 }
  0xda   : > { %v437_v48 = vpop.f32.mrf.mxu0  ;;  %v1055_v7 = vpop.f32.mrf.mxu1  ;;  %v530_v10 = vmax.f32 %v495_v58, 0.0 }
  0xdb   : > { %v507_v56 = vmax.f32 %v437_v48, 0.0  ;;  %v517_v39 = vmax.f32 %v1055_v7, 0.0 }
  0xe1   : > { %v497_v3 = vpop.f32.mrf.mxu3 }
  0xe2   : > { %v440_v50 = vpop.f32.mrf.mxu0  ;;  %v531_v6 = vmax.f32 %v497_v3, 0.0  ;;  %v465_v20 = vpop.f32.mrf.mxu1 }
  0xe3   : > { %v508_v54 = vmax.f32 %v440_v50, 0.0  ;;  %v518_v38 = vmax.f32 %v465_v20, 0.0 }
  0xea   : > { %v442_v52 = vpop.f32.mrf.mxu0  ;;  %v467_v32 = vpop.f32.mrf.mxu1 }
  0xeb   : > { %v509_v53 = vmax.f32 %v442_v52, 0.0  ;;  %v519_v36 = vmax.f32 %v467_v32, 0.0 }
  0xed   : > { %544 = vmatpush.msrb.mxu2 %v509_v53 }
  0xef   : > { %545 = vmatpush.msrb.mxu2 %v508_v54 }
  0xf1   : > { %546 = vmatpush.msrb.mxu2 %v507_v56 }
  0xf3   : > { %547 = vmatpush.msrb.mxu2 %v506_v57 }
  0xf5   : > { %548 = vmatpush.msrb.mxu2 %v505_v59 }
  0xf7   : > { %549 = vmatpush.msrb.mxu2 %v504_v60 }
  0xf9   : > { %550 = vmatpush.msrb.mxu2 %v503_v62 }
  0xfb   : > { %551 = vmatpush.msrb.mxu2 %v502_v0 }
  0xfd   : > { %552 = vmatpush.msrb.mxu2 %v501_v2 }
  0xff   : > { %553 = vmatpush.msrb.mxu2 %v500_v4 }
 0x100   : > { %554 = vmatmul.f32.vlgmr.msrb.gmra.mxu2 %v534_v5 }
 0x101   : > { %558 = vmatpush.msra.mxu2 %v531_v6 }
 0x103   : > { %559 = vmatpush.msra.mxu2 %v530_v10 }
 0x105   : > { %560 = vmatpush.msra.mxu2 %v529_v13 }
 0x107   : > { %561 = vmatpush.msra.mxu2 %v528_v15 }
 0x109   : > { %562 = vmatpush.msra.mxu2 %v527_v17 }
 0x10b   : > { %563 = vmatpush.msra.mxu2 %v526_v19 }
 0x10d   : > { %564 = vmatpush.msra.mxu2 %v525_v22 }
 0x10f   : > { %565 = vmatpush.msra.mxu2 %v524_v25 }
 0x111   : > { %566 = vmatpush.msra.mxu2 %v523_v27 }
 0x113   : > { %567 = vmatpush.msra.mxu2 %v522_v29 }
 0x115   : > { %568 = vmatpush.msra.mxu2 %v521_v31 }
 0x117   : > { %569 = vmatpush.msra.mxu2 %v520_v34 }
 0x119   : > { %570 = vmatpush.msra.mxu2 %v519_v36 }
 0x11b   : > { %571 = vmatpush.msra.mxu2 %v518_v38 }
 0x11d   : > { %572 = vmatpush.msra.mxu2 %v517_v39 }
 0x11f   : > { %573 = vmatpush.msra.mxu2 %v516_v41 }
 0x120   : > { %574 = vmatmul.f32.vlgmr.msra.gmra.mxu2 %v535_v40 }
 0x183   : > { %v555_v44 = vpop.f32.mrf.mxu2 }
 0x1a3   : > { %v575_v45 = vpop.f32.mrf.mxu2 }
 0x1a4   : > { %v576_v46 = vadd.f32 %v575_v45, %v555_v44 }
 0x1a6   : > { %611 = vmatmul.f32.vlgmr.msrb.gmra.mxu3 %v576_v46 }
 0x229   : > { %v612_v48 = vpop.f32.mrf.mxu3 }
 0x22a   : > { %v613_v49 = vadd.f32 %v612_v48, %v594_v47 }
 0x22c   : > { %615 = vst [vmem:[%s216_s8] sm:$0x1] %v613_v49 }
 0x22d   : > { %875 = shalt.err (!%p872_p3)
}
 0x22e   : > { %808 = dma.vmem_to_hbm [thread:$0]  (%p981_p5), %s628_s9, 16, %s630_s10, %s617_s11  }
 0x22f PF: > { %p814_p4 = scmp.ge.s32.totalorder %s910_s21, 2  ;;  %s641_s23 = sand.u32 1, %s898_s18  }
 0x230   : > { %s642_s25 = scalar_lea.sflag [#allocation3], %s641_s23 }
 0x231   : > { %p811_p7 = pnand %p814_p4, %p985_p6 }
 0x233   : > { %p812_p8 = pneg %p811_p7 }
 0x235   : > { %893 = dma.done.wait (%p812_p8), %s642_s25, 16  }
 0x236   : > { %895 = vsyncadd (%p812_p8), %s642_s25, 4294967280  ;;  %p15_p9 = scmp.ge.s32.totalorder %s968_s24, 4   ;;  %s1155_s18 = smov %s902_s19 }
 0x237   : > { %s1156_s19 = smov %s906_s20  ;;  %s1157_s20 = smov %s979_s27 }
 0x238   : > { %s1158_s21 = smov %s968_s24  ;;  %17 = sbr.rel (!%p15_p9) target bundleno = 3 (0x3), region = 75 }
 0x23d   :  { %647 = vsyncpa [#allocation3], 1 }
 0x23e   :  { %649 = vsyncpa [#allocation3 + $0x1], 1 }

</bundles_post_ra>
